<compile_context>
chip_gen: v5e
topology: v5e:2x2
jax: 0.10.0
libtpu: 0.0.40
codegen_flags: <defaults>
</compile_context>

<pallas_src>
import math

import jax
import jax.numpy as jnp
import numpy as np
from jax.experimental import pallas as pl
from jax.experimental.pallas import tpu as pltpu


# ----------------------------------------------------------------------------
# Deterministic parameter construction (mirrors the PyTorch __init__).
# ----------------------------------------------------------------------------
def generate_random_orthogonal_matrix(feat_in, num_classes, seed=0):
    rng = np.random.RandomState(seed)
    rand_mat = rng.random_sample(size=(feat_in, num_classes))
    orth_vec, _ = np.linalg.qr(rand_mat)
    assert np.allclose(
        orth_vec.T @ orth_vec, np.eye(num_classes), atol=1e-6
    ), "QR did not produce orthonormal columns"
    return orth_vec.astype(np.float32)


def make_rotated_etf_params(in_feat, out_feat, base_class, seed=0):
    assert out_feat <= in_feat
    orth_vec = generate_random_orthogonal_matrix(in_feat, out_feat, seed)
    i_nc_nc = np.eye(out_feat, dtype=np.float32)
    one_nc_nc = np.full((out_feat, out_feat), 1.0 / out_feat, dtype=np.float32)
    etf_vec = (orth_vec @ (i_nc_nc - one_nc_nc)) * math.sqrt(
        out_feat / (out_feat - 1)
    )
    # F.normalize(p=2, dim=0): unit L2 norm per column.
    norms = np.maximum(np.linalg.norm(etf_vec, axis=0, keepdims=True), 1e-12)
    etf_vec = (etf_vec / norms).astype(np.float32)

    etf_mag = np.ones((1, out_feat), dtype=np.float32)      # nn.Parameter ones
    orthonormal = np.eye(in_feat, dtype=np.float32)         # rotation, init eye
    # (etf_null buffer is unused in forward; omitted.)
    return (
        jnp.asarray(orthonormal),
        jnp.asarray(etf_vec),
        jnp.asarray(etf_mag),
    )


# ----------------------------------------------------------------------------
# Kernels
# ----------------------------------------------------------------------------
def rotated_etf_kernel(x_ref, r_ref, etf_ref, mag_ref, o_ref):
    # x_ref   : [TB, in_feat]          (batch tile, double-buffered)
    # r_ref   : [in_feat, in_feat]     (VMEM-resident across grid steps)
    # etf_ref : [in_feat, out_feat]    (VMEM-resident across grid steps)
    # mag_ref : [1, out_feat]  f32     (VMEM-resident across grid steps)
    # o_ref   : [TB, out_feat]
    # GEMM 1 on MXU: rotate features. f32 accumulation regardless of operand dtype.
    xr = jnp.dot(x_ref[...], r_ref[...], preferred_element_type=jnp.float32)
    # GEMM 2 on MXU: project onto (unscaled) ETF directions.
    acc = jnp.dot(
        xr.astype(etf_ref.dtype), etf_ref[...], preferred_element_type=jnp.float32
    )
    # Epilogue: apply per-class magnitude on the small [TB, out_feat] accumulator
    # in f32 (algebraically identical to scaling the weight, far less VPU work).
    o_ref[...] = (acc * mag_ref[...]).astype(o_ref.dtype)


def folded_gemm_kernel(x_ref, w_ref, o_ref):
    # Single GEMM: out = x @ W_eff, W_eff = R @ (etf_vec * etf_mag) precomputed.
    o_ref[...] = jnp.dot(
        x_ref[...], w_ref[...], preferred_element_type=jnp.float32
    ).astype(o_ref.dtype)


# ----------------------------------------------------------------------------
# Wrappers
# ----------------------------------------------------------------------------
def _vmem_limit_bytes(weight_bytes, tile_bytes):
    # weights (single resident fetch) + double-buffered x/out tiles + margin,
    # clamped to a range valid on v5e/v6e/v7x (v7x physical VMEM is 64 MiB).
    lim = int(weight_bytes + 2 * tile_bytes + (4 << 20))
    return min(max(lim, 16 << 20), 64 << 20)


def rotated_etf_forward(
    x, orthonormal, etf_vec, etf_mag, *, block_b=256, compute_dtype=None
):
    """Fused (x @ R) @ etf_vec * etf_mag with batch-tiled grid, weights resident."""
    B, in_feat = x.shape
    out_feat = etf_vec.shape[1]

    if compute_dtype is not None:
        x_c = x.astype(compute_dtype)
        r_c = orthonormal.astype(compute_dtype)
        e_c = etf_vec.astype(compute_dtype)
    else:
        x_c, r_c, e_c = x, orthonormal, etf_vec
    mag = etf_mag.astype(jnp.float32)  # epilogue stays f32 (v5e has no bf16 VPU)

    tb = min(block_b, B)
    grid = (pl.cdiv(B, tb),)

    isz = jnp.dtype(x_c.dtype).itemsize
    weight_bytes = (in_feat * in_feat + in_feat * out_feat) * isz + out_feat * 4
    tile_bytes = tb * in_feat * isz + tb * out_feat * jnp.dtype(x.dtype).itemsize

    return pl.pallas_call(
        rotated_etf_kernel,
        out_shape=jax.ShapeDtypeStruct((B, out_feat), x.dtype),
        grid=grid,
        in_specs=[
            pl.BlockSpec((tb, in_feat), lambda i: (i, 0)),        # x: batch-tiled
            pl.BlockSpec((in_feat, in_feat), lambda i: (0, 0)),   # R: resident
            pl.BlockSpec((in_feat, out_feat), lambda i: (0, 0)),  # etf_vec: resident
            pl.BlockSpec((1, out_feat), lambda i: (0, 0)),        # etf_mag: resident
        ],
        out_specs=pl.BlockSpec((tb, out_feat), lambda i: (i, 0)),
        compiler_params=pltpu.CompilerParams(
            dimension_semantics=("parallel",),
            vmem_limit_bytes=_vmem_limit_bytes(weight_bytes, tile_bytes),
        ),
    )(x_c, r_c, e_c, mag)


def rotated_etf_forward_folded(
    x, orthonormal, etf_vec, etf_mag, *, block_b=256, compute_dtype=None
):
    """Inference path: precompute W_eff = R @ (etf_vec * etf_mag) once (plain JAX),
    then a single batch-tiled GEMM x @ W_eff inside Pallas."""
    B, in_feat = x.shape
    out_feat = etf_vec.shape[1]

    w_eff = orthonormal.astype(jnp.float32) @ (
        etf_vec.astype(jnp.float32) * etf_mag.astype(jnp.float32)
    )
    if compute_dtype is not None:
        x_c = x.astype(compute_dtype)
        w_c = w_eff.astype(compute_dtype)
    else:
        x_c, w_c = x, w_eff

    tb = min(block_b, B)
    grid = (pl.cdiv(B, tb),)

    isz = jnp.dtype(x_c.dtype).itemsize
    weight_bytes = in_feat * out_feat * isz
    tile_bytes = tb * in_feat * isz + tb * out_feat * jnp.dtype(x.dtype).itemsize

    return pl.pallas_call(
        folded_gemm_kernel,
        out_shape=jax.ShapeDtypeStruct((B, out_feat), x.dtype),
        grid=grid,
        in_specs=[
            pl.BlockSpec((tb, in_feat), lambda i: (i, 0)),        # x: batch-tiled
            pl.BlockSpec((in_feat, out_feat), lambda i: (0, 0)),  # W_eff: resident
        ],
        out_specs=pl.BlockSpec((tb, out_feat), lambda i: (i, 0)),
        compiler_params=pltpu.CompilerParams(
            dimension_semantics=("parallel",),
            vmem_limit_bytes=_vmem_limit_bytes(weight_bytes, tile_bytes),
        ),
    )(x_c, w_c)


# ----------------------------------------------------------------------------
if __name__ == "__main__":
    # Small shapes consistent with the module (feature-vector classifier head).
    # Note: at these sizes the kernel is launch/DMA-latency bound; the tiling and
    # dtype choices above are what matter at realistic B / in_feat / out_feat.
    B, IN_FEAT, OUT_FEAT, BASE_CLASS = 8, 64, 32, 16

    orthonormal, etf_vec, etf_mag = make_rotated_etf_params(
        IN_FEAT, OUT_FEAT, BASE_CLASS, seed=0
    )

    key = jax.random.PRNGKey(0)
    x = jax.random.normal(key, (B, IN_FEAT), dtype=jnp.float32)

    # Pure-JAX reference.
    ref = (x @ orthonormal) @ (etf_vec * etf_mag)

    # 1) Fused two-GEMM kernel, f32 operands (bit-for-bit-ish path).
    out_f32 = jax.block_until_ready(
        rotated_etf_forward(x, orthonormal, etf_vec, etf_mag)
    )
    np.testing.assert_allclose(
        np.asarray(out_f32), np.asarray(ref), atol=1e-5, rtol=1e-5
    )

    # 2) Fused two-GEMM kernel, bf16 operands / f32 accumulation + f32 epilogue.
    out_bf16 = jax.block_until_ready(
        rotated_etf_forward(
            x, orthonormal, etf_vec, etf_mag, compute_dtype=jnp.bfloat16
        )
    )
    np.testing.assert_allclose(
        np.asarray(out_bf16), np.asarray(ref), atol=3e-2, rtol=3e-2
    )

    # 3) Folded single-GEMM inference path (W_eff precomputed in plain JAX).
    out_folded = jax.block_until_ready(
        rotated_etf_forward_folded(x, orthonormal, etf_vec, etf_mag)
    )
    np.testing.assert_allclose(
        np.asarray(out_folded), np.asarray(ref), atol=1e-5, rtol=1e-5
    )

    print("KERNEL_OK")
</pallas_src>

<mosaic_0001>
module attributes {stable_mosaic.version = 11 : i64} {
  func.func @rotated_etf_kernel(%arg0: i32, %arg1: memref<8x64xf32, #tpu.memory_space<vmem>>, %arg2: memref<64x64xf32, #tpu.memory_space<vmem>>, %arg3: memref<64x32xf32, #tpu.memory_space<vmem>>, %arg4: memref<1x32xf32, #tpu.memory_space<vmem>>, %arg5: memref<8x32xf32, #tpu.memory_space<vmem>>) attributes {dimension_semantics = [#tpu.dimension_semantics<parallel>], iteration_bounds = array<i64: 1>, scalar_prefetch = 0 : i64, scratch_operands = 0 : i64, tpu.core_type = #tpu.core_type<tc>, window_params = [{transform_indices = @transform_0, window_bounds = array<i64: 8, 64>}, {pipeline_mode = #tpu.pipeline_mode<synchronous>, transform_indices = @transform_1, window_bounds = array<i64: 64, 64>}, {pipeline_mode = #tpu.pipeline_mode<synchronous>, transform_indices = @transform_2, window_bounds = array<i64: 64, 32>}, {pipeline_mode = #tpu.pipeline_mode<synchronous>, transform_indices = @transform_3, window_bounds = array<i64: 1, 32>}, {transform_indices = @transform_4, window_bounds = array<i64: 8, 32>}]} {
    %c0 = arith.constant 0 : index
    %c0_0 = arith.constant 0 : index
    %0 = vector.load %arg1[%c0, %c0_0] : memref<8x64xf32, #tpu.memory_space<vmem>>, vector<8x64xf32>
    %c0_1 = arith.constant 0 : index
    %c0_2 = arith.constant 0 : index
    %1 = vector.load %arg2[%c0_1, %c0_2] : memref<64x64xf32, #tpu.memory_space<vmem>>, vector<64x64xf32>
    %cst = arith.constant dense<0.000000e+00> : vector<8x64xf32>
    %2 = tpu.matmul %0, %1, %cst {dimension_numbers = #tpu.dot_dimension_numbers<[1], [0], [0], [1], [0, 0, 1, 1], [], []>} : vector<8x64xf32>, vector<64x64xf32>, vector<8x64xf32> -> vector<8x64xf32>
    %c0_3 = arith.constant 0 : index
    %c0_4 = arith.constant 0 : index
    %3 = vector.load %arg3[%c0_3, %c0_4] : memref<64x32xf32, #tpu.memory_space<vmem>>, vector<64x32xf32>
    %cst_5 = arith.constant dense<0.000000e+00> : vector<8x32xf32>
    %4 = tpu.matmul %2, %3, %cst_5 {dimension_numbers = #tpu.dot_dimension_numbers<[1], [0], [0], [1], [0, 0, 1, 1], [], []>} : vector<8x64xf32>, vector<64x32xf32>, vector<8x32xf32> -> vector<8x32xf32>
    %c0_6 = arith.constant 0 : index
    %c0_7 = arith.constant 0 : index
    %5 = vector.load %arg4[%c0_6, %c0_7] : memref<1x32xf32, #tpu.memory_space<vmem>>, vector<1x32xf32>
    %6 = vector.broadcast %5 : vector<1x32xf32> to vector<8x32xf32>
    %7 = arith.mulf %4, %6 : vector<8x32xf32>
    %c0_8 = arith.constant 0 : index
    %c0_9 = arith.constant 0 : index
    %8 = vector.load %arg5[%c0_8, %c0_9] : memref<8x32xf32, #tpu.memory_space<vmem>>, vector<8x32xf32>
    tpu.vector_store %arg5[%c0_8, %c0_9], %7 {strides = array<i32>} : memref<8x32xf32, #tpu.memory_space<vmem>>, vector<8x32xf32>,
    return
  }
  func.func @transform_0(%arg0: i32) -> (i32, i32) {
    %c0_i32 = arith.constant 0 : i32
    %c0_i32_0 = arith.constant 0 : i32
    return %arg0, %c0_i32 : i32, i32
  }
  func.func @transform_1(%arg0: i32) -> (i32, i32) {
    %c0_i32 = arith.constant 0 : i32
    %c0_i32_0 = arith.constant 0 : i32
    %c0_i32_1 = arith.constant 0 : i32
    return %c0_i32, %c0_i32_0 : i32, i32
  }
  func.func @transform_2(%arg0: i32) -> (i32, i32) {
    %c0_i32 = arith.constant 0 : i32
    %c0_i32_0 = arith.constant 0 : i32
    %c0_i32_1 = arith.constant 0 : i32
    return %c0_i32, %c0_i32_0 : i32, i32
  }
  func.func @transform_3(%arg0: i32) -> (i32, i32) {
    %c0_i32 = arith.constant 0 : i32
    %c0_i32_0 = arith.constant 0 : i32
    %c0_i32_1 = arith.constant 0 : i32
    return %c0_i32, %c0_i32_0 : i32, i32
  }
  func.func @transform_4(%arg0: i32) -> (i32, i32) {
    %c0_i32 = arith.constant 0 : i32
    %c0_i32_0 = arith.constant 0 : i32
    return %arg0, %c0_i32 : i32, i32
  }
}

</mosaic_0001>

<bundles_post_ra>
// kernel: tpu_custom_call.1
= control target key start
LH: loop header
LB: loop body
LE: loop exit
PB: predicated region body
PF: predicated region fallthrough
CT: control target
= control target key end

     0   :  { %s218_s0 = inlined_call_operand.vmem [shape: f32[8,64], index: 0, kind: input, shape index: {}]   ;;  %s219_s1 = inlined_call_operand.vmem [shape: f32[64,64], index: 1, kind: input, shape index: {}]   ;;  %s220_s2 = inlined_call_operand.vmem [shape: f32[64,32], index: 2, kind: input, shape index: {}]   ;;  %s221_s3 = inlined_call_operand.vmem [shape: f32[1,32], index: 3, kind: input, shape index: {}]   ;;  %s222_s4 = inlined_call_operand.hbm [shape: f32[8,32], index: 4, kind: output, shape index: {}]  }
   0x1   :  { %v26_v0 = vld [vmem:[%s219_s1 + $0x38] sm:$0xff]  ;;  %v25_v1 = vld [vmem:[%s219_s1 + $0x30] sm:$0xff]  ;;  %v24_v2 = vld [vmem:[%s219_s1 + $0x28] sm:$0xff] }
   0x2   :  { %39 = vmatpush.msra.mxu0 %v26_v0  ;;  %v58_v3 = vld [vmem:[%s220_s2 + $0x38] sm:$0xff]  ;;  %v57_v4 = vld [vmem:[%s220_s2 + $0x30] sm:$0xff]  ;;  %v23_v5 = vld [vmem:[%s219_s1 + $0x20] sm:$0xff] }
   0x3   :  { %70 = vmatpush.msra.mxu1 %v58_v3  ;;  %v56_v6 = vld [vmem:[%s220_s2 + $0x28] sm:$0xff] }
   0x4   :  { %40 = vmatpush.msra.mxu0 %v25_v1 }
   0x6   :  { %41 = vmatpush.msra.mxu0 %v24_v2 }
   0x7   :  { %9 = vsyncpa [#allocation3], 0  ;;  %v22_v7 = vld [vmem:[%s219_s1 + $0x18] sm:$0xff]  ;;  %71 = vmatpush.msra.mxu1 %v57_v4  ;;  %v55_v8 = vld [vmem:[%s220_s2 + $0x20] sm:$0xff]  ;;  %vm27_vm0 = vcmask 523264   ;;  %s96_s27 = sshll.u32 %s222_s4, 4  ;;  %s97_s27 = int_to_ptr.hbm [resolvable:$true] %s96_s27 }
   0x8   :  { %42 = vmatpush.msra.mxu0 %v23_v5  ;;  %v21_v9 = vld [vmem:[%s219_s1 + $0x10] sm:$0xff]  ;;  %v54_v10 = vld [vmem:[%s220_s2 + $0x18] sm:$0xff]  ;;  %v20_v11 = vld [vmem:[%s219_s1 + $0x8] sm:$0xff]  ;;  %vm87_vm1 = vcmask 261120  }
   0x9   :  { %72 = vmatpush.msra.mxu1 %v56_v6  ;;  %v53_v12 = vld [vmem:[%s220_s2 + $0x10] sm:$0xff]  ;;  %v19_v13 = vld [vmem:[%s219_s1] sm:$0xff]  ;;  %v52_v15 = vld [vmem:[%s220_s2 + $0x8] sm:$0xff] }
   0xa   :  { %43 = vmatpush.msra.mxu0 %v22_v7  ;;  %v18_v14 = vld [vmem:[%s218_s0] sm:$0xff]  ;;  %s135_s0 = smov [#allocation2]  }
   0xb   :  { %73 = vmatpush.msra.mxu1 %v55_v8  ;;  %v51_v16 = vld [vmem:[%s220_s2] sm:$0xff]  ;;  %s94_s24 = sshll.u32 %s135_s0, 4  ;;  %s95_s24 = int_to_ptr.vmem [resolvable:$true] %s94_s24 }
   0xc   :  { %44 = vmatpush.msra.mxu0 %v21_v9  ;;  %v108_v18 = vld [vmem:[%s221_s3] ss:$0 sm:$0xff] }
   0xd   :  { %74 = vmatpush.msra.mxu1 %v54_v10 }
   0xe   :  { %45 = vmatpush.msra.mxu0 %v20_v11 }
   0xf   :  { %75 = vmatpush.msra.mxu1 %v53_v12 }
  0x10   :  { %46 = vmatpush.msra.mxu0 %v19_v13 }
  0x11   :  { %105 = vmatmul.msk.f32.vlgmr.msra.gmra.mxu0 %vm27_vm0, %v18_v14  ;;  %76 = vmatpush.msra.mxu1 %v52_v15 }
  0x13   :  { %77 = vmatpush.msra.mxu1 %v51_v16 }
  0x8e   :  { %v48_v17 = vpop.f32.mrf.mxu0 }
  0x8f   :  { %106 = vmatmul.msk.f32.vlgmr.msra.gmra.mxu1 %vm27_vm0, %v48_v17 }
 0x10c   :  { %v79_v19 = vpop.f32.mrf.mxu1 }
 0x10d   :  { %v86_v20 = vmul.f32 %v108_v18, %v79_v19 }
 0x10f   :  { %88 = vst.msk [vmem:[#allocation2] sm:$0xff] %vm87_vm1, %v86_v20 }
 0x110   :  { %99 = dma.vmem_to_hbm [thread:$0]  %s95_s24, 128, %s97_s27, [#allocation3]  }
 0x111   :  { %133 = dma.done.wait [#allocation3], 128  }
 0x112   :  { %134 = vsyncadd [#allocation3], 4294967168 }
 0x113   :  { %104 = vsyncpa [#allocation3], 1 }

</bundles_post_ra>
